<compile_context>
chip_gen: v7x
topology: tpu7x:2x2x1
jax: 0.10.0
libtpu: 0.0.40
codegen_flags: <defaults>
</compile_context>

<pallas_src>
import functools
import math

import jax
import jax.numpy as jnp
import numpy as np
from jax.experimental import pallas as pl
from jax.experimental.pallas import tpu as pltpu


# ------------------------------ small helpers -------------------------------- #
def _is_pow2(m):
    return (m & (m - 1)) == 0


def _mod(a, m):
    return (a & (m - 1)) if _is_pow2(m) else (a % m)


def _div(a, m):
    return (a >> (m.bit_length() - 1)) if _is_pow2(m) else (a // m)


# ------------------------------- Pallas kernel ------------------------------- #
def bottleneck_kernel(x_ref, w1_ref, w2_ref, w3_ref, b1_ref, b2_ref, b3_ref, o_ref,
                      *, H, W):
    # x_ref : (Cin, L) f32 for ONE image, L = H*W (lanes = flattened (h, w))
    # w1_ref: (Pp, Cin)      bf16  conv1 weight, bn1 scale folded, rows padded to Pp
    # w2_ref: (Pp, 9*Pp)     bf16  conv2 weight (tap-major), bn2 scale folded, padded
    # w3_ref: (Cout, Pp+Cin) bf16  [conv3 weight (bn3 folded) | eye(Cout, Cin)]
    # bX_ref: (C, 1) f32 folded-BN biases (zero in padded rows)
    L = H * W
    x = x_ref[...]                                        # (Cin, L) f32
    x_bf = x.astype(jnp.bfloat16)

    # ---- conv1 (1x1) + folded bn1 + relu ------------------------------------
    y1 = jnp.dot(w1_ref[...], x_bf, preferred_element_type=jnp.float32)
    y1 = jnp.maximum(y1 + b1_ref[...], 0.0)               # (Pp, L) f32

    # ---- conv2 (3x3, stride 1, pad 1) + folded bn2 + relu --------------------
    # 9 taps = XLU lane rotations of y1 + image-edge masks; one K=9*Pp MXU matmul.
    idx = jax.lax.broadcasted_iota(jnp.int32, (1, L), 1)
    wpos = _mod(idx, W)                                    # w coordinate per lane
    hpos = _div(idx, W)                                    # h coordinate per lane
    h_ok = {-1: hpos >= 1, 0: None, 1: hpos < H - 1}
    w_ok = {-1: wpos >= 1, 0: None, 1: wpos < W - 1}

    taps = []
    for dh in (-1, 0, 1):
        for dw in (-1, 0, 1):
            off = dh * W + dw
            # want out[:, i] = y1[:, i + off]  ->  jnp.roll convention shift = -off.
            tap = y1 if off == 0 else pltpu.roll(y1, shift=(-off) % L, axis=1)
            conds = [c for c in (h_ok[dh], w_ok[dw]) if c is not None]
            if conds:
                valid = functools.reduce(jnp.logical_and, conds)
                tap = jnp.where(valid, tap, 0.0)           # zero-pad semantics (f32 select)
            taps.append(tap)
    # nine (Pp, L) f32 pieces at 8-row-aligned sublane offsets -> no repack.
    stacked = jnp.concatenate(taps, axis=0).astype(jnp.bfloat16)      # (9*Pp, L)
    y2 = jnp.dot(w2_ref[...], stacked, preferred_element_type=jnp.float32)
    y2 = jnp.maximum(y2 + b2_ref[...], 0.0)                # (Pp, L) f32

    # ---- conv3 (1x1) + folded bn3, fused zero-padded identity, relu ----------
    z = jnp.concatenate([y2, x], axis=0).astype(jnp.bfloat16)         # (Pp+Cin, L)
    y3 = jnp.dot(w3_ref[...], z, preferred_element_type=jnp.float32)
    o_ref[...] = jnp.maximum(y3 + b3_ref[...], 0.0).astype(o_ref.dtype)


# ------------------------- parameter folding for kernel ----------------------- #
def prepare_kernel_params(params, sublane=8):
    """Fold BN scales into conv weights, pad channel dims to the f32 sublane granule,
    augment conv3 with the identity eye block, cast matmul weights to bf16."""
    w1, w2, w3, s1, b1, s2, b2, s3, b3 = params
    cin, p = w1.shape
    cout = w3.shape[1]
    pp = ((p + sublane - 1) // sublane) * sublane          # padded planes (>= 8)

    # conv1: (Cin, P) -> (Pp, Cin), bn1 scale folded on output channel.
    w1t = jnp.pad((w1 * s1[None, :]).T, ((0, pp - p), (0, 0))).astype(jnp.bfloat16)

    # conv2: (3,3,Pin,Pout) -> pad channels -> (Pp, 9*Pp) tap-major, bn2 folded.
    w2s = w2 * s2[None, None, None, :]
    w2p = jnp.pad(w2s, ((0, 0), (0, 0), (0, pp - p), (0, pp - p)))
    w2r = w2p.transpose(3, 0, 1, 2).reshape(pp, 9 * pp).astype(jnp.bfloat16)

    # conv3: (P, Cout) -> (Cout, Pp), bn3 folded, augmented with eye(Cout, Cin)
    # (identity channel-zero-pad + add fused into the matmul).
    w3t = jnp.pad((w3 * s3[None, :]).T, ((0, 0), (0, pp - p)))
    w3aug = jnp.concatenate([w3t, jnp.eye(cout, cin, dtype=jnp.float32)],
                            axis=1).astype(jnp.bfloat16)   # (Cout, Pp+Cin)

    b1k = jnp.pad(b1, (0, pp - p)).reshape(pp, 1).astype(jnp.float32)
    b2k = jnp.pad(b2, (0, pp - p)).reshape(pp, 1).astype(jnp.float32)
    b3k = b3.reshape(cout, 1).astype(jnp.float32)
    return w1t, w2r, w3aug, b1k, b2k, b3k


# ---------------------------------- wrapper ----------------------------------- #
@jax.jit
def bottleneck_forward(x_nchw, params):
    N, Cin, H, W = x_nchw.shape
    L = H * W
    assert L % 128 == 0, "lane axis (H*W) must be a multiple of 128"

    w1t, w2r, w3aug, b1k, b2k, b3k = prepare_kernel_params(params)
    Cout = w3aug.shape[0]

    # Free metadata reshape (no transpose): per-image channel-major (Cin, H*W).
    x3 = x_nchw.reshape(N, Cin, L)

    kernel = functools.partial(bottleneck_kernel, H=H, W=W)
    out3 = pl.pallas_call(
        kernel,
        out_shape=jax.ShapeDtypeStruct((N, Cout, L), jnp.float32),
        grid=(N,),
        in_specs=[
            pl.BlockSpec((None, Cin, L), lambda n: (n, 0, 0)),   # one image per step
            pl.BlockSpec(w1t.shape, lambda n: (0, 0)),           # weights resident
            pl.BlockSpec(w2r.shape, lambda n: (0, 0)),
            pl.BlockSpec(w3aug.shape, lambda n: (0, 0)),
            pl.BlockSpec(b1k.shape, lambda n: (0, 0)),
            pl.BlockSpec(b2k.shape, lambda n: (0, 0)),
            pl.BlockSpec(b3k.shape, lambda n: (0, 0)),
        ],
        out_specs=pl.BlockSpec((None, Cout, L), lambda n: (n, 0, 0)),
        compiler_params=pltpu.CompilerParams(
            dimension_semantics=("parallel",)),                  # both TCs on v7x
    )(x3, w1t, w2r, w3aug, b1k, b2k, b3k)

    return out3.reshape(N, Cout, H, W)                           # free reshape back to NCHW


# ----------------------------- pure-JAX reference ------------------------------ #
def reference_forward(x, params):
    w1, w2, w3, s1, b1, s2, b2, s3, b3 = params
    cin = w1.shape[0]
    cout = w3.shape[1]
    y = jnp.einsum('nchw,cp->nphw', x, w1)
    y = jnp.maximum(y * s1[None, :, None, None] + b1[None, :, None, None], 0.0)
    y = jax.lax.conv_general_dilated(
        y, w2, window_strides=(1, 1), padding=((1, 1), (1, 1)),
        dimension_numbers=('NCHW', 'HWIO', 'NCHW'))
    y = jnp.maximum(y * s2[None, :, None, None] + b2[None, :, None, None], 0.0)
    y = jnp.einsum('nphw,pq->nqhw', y, w3)
    y = y * s3[None, :, None, None] + b3[None, :, None, None]
    ident = jnp.pad(x, ((0, 0), (0, cout - cin), (0, 0), (0, 0)))
    return jnp.maximum(y + ident, 0.0)


# ----------------------------- parameter creation ------------------------------ #
def make_params(key, inplanes, planes):
    expansion = 4
    cout = planes * expansion
    ks = jax.random.split(key, 15)

    w1 = jax.random.normal(ks[0], (inplanes, planes), jnp.float32) / math.sqrt(inplanes)
    w2 = jax.random.normal(ks[1], (3, 3, planes, planes), jnp.float32) / math.sqrt(9 * planes)
    w3 = jax.random.normal(ks[2], (planes, cout), jnp.float32) / math.sqrt(planes)

    def bn_fold(k0, k1, k2, k3, c):
        # BatchNorm2d (eval mode) folded to per-channel scale/bias.
        gamma = 1.0 + 0.1 * jax.random.normal(k0, (c,), jnp.float32)
        beta = 0.1 * jax.random.normal(k1, (c,), jnp.float32)
        mean = 0.1 * jax.random.normal(k2, (c,), jnp.float32)
        var = jax.random.uniform(k3, (c,), jnp.float32, minval=0.5, maxval=1.5)
        scale = gamma / jnp.sqrt(var + 1e-5)
        bias = beta - mean * scale
        return scale, bias

    s1, b1 = bn_fold(ks[3], ks[4], ks[5], ks[6], planes)
    s2, b2 = bn_fold(ks[7], ks[8], ks[9], ks[10], planes)
    s3, b3 = bn_fold(ks[11], ks[12], ks[13], ks[14], cout)
    return (w1, w2, w3, s1, b1, s2, b2, s3, b3)


if __name__ == "__main__":
    N, inplanes, planes, H, W = 2, 4, 4, 16, 16   # PyTorch x: (2, 4, 16, 16) NCHW
    cout = planes * 4

    key = jax.random.PRNGKey(0)
    kx, kp = jax.random.split(key)
    x = jax.random.normal(kx, (N, inplanes, H, W), jnp.float32)
    params = make_params(kp, inplanes, planes)

    out = bottleneck_forward(x, params)
    jax.block_until_ready(out)

    ref = reference_forward(x, params)
    assert out.shape == (N, cout, H, W), out.shape
    # bf16 matmul operands (f32 accumulation) -> slightly looser tolerance than pure f32.
    np.testing.assert_allclose(np.asarray(out), np.asarray(ref), rtol=5e-2, atol=5e-2)

    print("KERNEL_OK")
</pallas_src>

<mosaic_0001>
module attributes {stable_mosaic.version = 11 : i64} {
  func.func @bottleneck_kernel(%arg0: i32, %arg1: memref<1x4x256xf32, #tpu.memory_space<vmem>>, %arg2: memref<8x4xbf16, #tpu.memory_space<vmem>>, %arg3: memref<8x72xbf16, #tpu.memory_space<vmem>>, %arg4: memref<16x12xbf16, #tpu.memory_space<vmem>>, %arg5: memref<8x1xf32, #tpu.memory_space<vmem>>, %arg6: memref<8x1xf32, #tpu.memory_space<vmem>>, %arg7: memref<16x1xf32, #tpu.memory_space<vmem>>, %arg8: memref<1x16x256xf32, #tpu.memory_space<vmem>>) attributes {dimension_semantics = [#tpu.dimension_semantics<parallel>], iteration_bounds = array<i64: 2>, scalar_prefetch = 0 : i64, scratch_operands = 0 : i64, tpu.core_type = #tpu.core_type<tc>, window_params = [{transform_indices = @transform_0, window_bounds = array<i64: 1, 4, 256>}, {pipeline_mode = #tpu.pipeline_mode<synchronous>, transform_indices = @transform_1, window_bounds = array<i64: 8, 4>}, {pipeline_mode = #tpu.pipeline_mode<synchronous>, transform_indices = @transform_2, window_bounds = array<i64: 8, 72>}, {pipeline_mode = #tpu.pipeline_mode<synchronous>, transform_indices = @transform_3, window_bounds = array<i64: 16, 12>}, {pipeline_mode = #tpu.pipeline_mode<synchronous>, transform_indices = @transform_4, window_bounds = array<i64: 8, 1>}, {pipeline_mode = #tpu.pipeline_mode<synchronous>, transform_indices = @transform_5, window_bounds = array<i64: 8, 1>}, {pipeline_mode = #tpu.pipeline_mode<synchronous>, transform_indices = @transform_6, window_bounds = array<i64: 16, 1>}, {transform_indices = @transform_7, window_bounds = array<i64: 1, 16, 256>}]} {
    %c0 = arith.constant 0 : index
    %c0_0 = arith.constant 0 : index
    %c0_1 = arith.constant 0 : index
    %0 = vector.load %arg1[%c0, %c0_0, %c0_1] : memref<1x4x256xf32, #tpu.memory_space<vmem>>, vector<1x4x256xf32>
    %1 = vector.shape_cast %0 : vector<1x4x256xf32> to vector<4x256xf32>
    %2 = arith.truncf %1 : vector<4x256xf32> to vector<4x256xbf16>
    %c0_2 = arith.constant 0 : index
    %c0_3 = arith.constant 0 : index
    %3 = vector.load %arg2[%c0_2, %c0_3] : memref<8x4xbf16, #tpu.memory_space<vmem>>, vector<8x4xbf16>
    %cst = arith.constant dense<0.000000e+00> : vector<8x256xf32>
    %4 = tpu.matmul %3, %2, %cst {dimension_numbers = #tpu.dot_dimension_numbers<[1], [0], [0], [1], [0, 0, 1, 1], [], []>} : vector<8x4xbf16>, vector<4x256xbf16>, vector<8x256xf32> -> vector<8x256xf32>
    %c0_4 = arith.constant 0 : index
    %c0_5 = arith.constant 0 : index
    %5 = vector.load %arg5[%c0_4, %c0_5] : memref<8x1xf32, #tpu.memory_space<vmem>>, vector<8x1xf32>
    %6 = vector.broadcast %5 : vector<8x1xf32> to vector<8x256xf32>
    %7 = arith.addf %4, %6 : vector<8x256xf32>
    %cst_6 = arith.constant 0.000000e+00 : f32
    %8 = vector.broadcast %cst_6 : f32 to vector<8x256xf32>
    %9 = arith.maximumf %7, %8 : vector<8x256xf32>
    %10 = tpu.iota {dimensions = array<i32: 1>} : vector<1x256xi32>
    %c15_i32 = arith.constant 15 : i32
    %11 = vector.broadcast %c15_i32 : i32 to vector<1x256xi32>
    %12 = arith.andi %10, %11 : vector<1x256xi32>
    %c4_i32 = arith.constant 4 : i32
    %13 = vector.broadcast %c4_i32 : i32 to vector<1x256xi32>
    %14 = arith.shrsi %10, %13 : vector<1x256xi32>
    %c1_i32 = arith.constant 1 : i32
    %15 = vector.broadcast %c1_i32 : i32 to vector<1x256xi32>
    %16 = arith.cmpi sge, %14, %15 : vector<1x256xi32>
    %c15_i32_7 = arith.constant 15 : i32
    %17 = vector.broadcast %c15_i32_7 : i32 to vector<1x256xi32>
    %18 = arith.cmpi slt, %14, %17 : vector<1x256xi32>
    %c1_i32_8 = arith.constant 1 : i32
    %19 = vector.broadcast %c1_i32_8 : i32 to vector<1x256xi32>
    %20 = arith.cmpi sge, %12, %19 : vector<1x256xi32>
    %c15_i32_9 = arith.constant 15 : i32
    %21 = vector.broadcast %c15_i32_9 : i32 to vector<1x256xi32>
    %22 = arith.cmpi slt, %12, %21 : vector<1x256xi32>
    %c17_i32 = arith.constant 17 : i32
    %23 = tpu.dynamic_rotate %9 by %c17_i32 dim 1 : vector<8x256xf32>, i32 -> vector<8x256xf32>
    %24 = arith.andi %16, %20 : vector<1x256xi1>
    %cst_10 = arith.constant 0.000000e+00 : f32
    %25 = vector.shape_cast %24 : vector<1x256xi1> to vector<1x256xi1>
    %26 = vector.broadcast %25 : vector<1x256xi1> to vector<8x256xi1>
    %27 = vector.broadcast %cst_10 : f32 to vector<8x256xf32>
    %28 = arith.select %26, %23, %27 : vector<8x256xi1>, vector<8x256xf32>
    %c16_i32 = arith.constant 16 : i32
    %29 = tpu.dynamic_rotate %9 by %c16_i32 dim 1 : vector<8x256xf32>, i32 -> vector<8x256xf32>
    %cst_11 = arith.constant 0.000000e+00 : f32
    %30 = vector.shape_cast %16 : vector<1x256xi1> to vector<1x256xi1>
    %31 = vector.broadcast %30 : vector<1x256xi1> to vector<8x256xi1>
    %32 = vector.broadcast %cst_11 : f32 to vector<8x256xf32>
    %33 = arith.select %31, %29, %32 : vector<8x256xi1>, vector<8x256xf32>
    %c15_i32_12 = arith.constant 15 : i32
    %34 = tpu.dynamic_rotate %9 by %c15_i32_12 dim 1 : vector<8x256xf32>, i32 -> vector<8x256xf32>
    %35 = arith.andi %16, %22 : vector<1x256xi1>
    %cst_13 = arith.constant 0.000000e+00 : f32
    %36 = vector.shape_cast %35 : vector<1x256xi1> to vector<1x256xi1>
    %37 = vector.broadcast %36 : vector<1x256xi1> to vector<8x256xi1>
    %38 = vector.broadcast %cst_13 : f32 to vector<8x256xf32>
    %39 = arith.select %37, %34, %38 : vector<8x256xi1>, vector<8x256xf32>
    %c1_i32_14 = arith.constant 1 : i32
    %40 = tpu.dynamic_rotate %9 by %c1_i32_14 dim 1 : vector<8x256xf32>, i32 -> vector<8x256xf32>
    %cst_15 = arith.constant 0.000000e+00 : f32
    %41 = vector.shape_cast %20 : vector<1x256xi1> to vector<1x256xi1>
    %42 = vector.broadcast %41 : vector<1x256xi1> to vector<8x256xi1>
    %43 = vector.broadcast %cst_15 : f32 to vector<8x256xf32>
    %44 = arith.select %42, %40, %43 : vector<8x256xi1>, vector<8x256xf32>
    %c255_i32 = arith.constant 255 : i32
    %45 = tpu.dynamic_rotate %9 by %c255_i32 dim 1 : vector<8x256xf32>, i32 -> vector<8x256xf32>
    %cst_16 = arith.constant 0.000000e+00 : f32
    %46 = vector.shape_cast %22 : vector<1x256xi1> to vector<1x256xi1>
    %47 = vector.broadcast %46 : vector<1x256xi1> to vector<8x256xi1>
    %48 = vector.broadcast %cst_16 : f32 to vector<8x256xf32>
    %49 = arith.select %47, %45, %48 : vector<8x256xi1>, vector<8x256xf32>
    %c241_i32 = arith.constant 241 : i32
    %50 = tpu.dynamic_rotate %9 by %c241_i32 dim 1 : vector<8x256xf32>, i32 -> vector<8x256xf32>
    %51 = arith.andi %18, %20 : vector<1x256xi1>
    %cst_17 = arith.constant 0.000000e+00 : f32
    %52 = vector.shape_cast %51 : vector<1x256xi1> to vector<1x256xi1>
    %53 = vector.broadcast %52 : vector<1x256xi1> to vector<8x256xi1>
    %54 = vector.broadcast %cst_17 : f32 to vector<8x256xf32>
    %55 = arith.select %53, %50, %54 : vector<8x256xi1>, vector<8x256xf32>
    %c240_i32 = arith.constant 240 : i32
    %56 = tpu.dynamic_rotate %9 by %c240_i32 dim 1 : vector<8x256xf32>, i32 -> vector<8x256xf32>
    %cst_18 = arith.constant 0.000000e+00 : f32
    %57 = vector.shape_cast %18 : vector<1x256xi1> to vector<1x256xi1>
    %58 = vector.broadcast %57 : vector<1x256xi1> to vector<8x256xi1>
    %59 = vector.broadcast %cst_18 : f32 to vector<8x256xf32>
    %60 = arith.select %58, %56, %59 : vector<8x256xi1>, vector<8x256xf32>
    %c239_i32 = arith.constant 239 : i32
    %61 = tpu.dynamic_rotate %9 by %c239_i32 dim 1 : vector<8x256xf32>, i32 -> vector<8x256xf32>
    %62 = arith.andi %18, %22 : vector<1x256xi1>
    %cst_19 = arith.constant 0.000000e+00 : f32
    %63 = vector.shape_cast %62 : vector<1x256xi1> to vector<1x256xi1>
    %64 = vector.broadcast %63 : vector<1x256xi1> to vector<8x256xi1>
    %65 = vector.broadcast %cst_19 : f32 to vector<8x256xf32>
    %66 = arith.select %64, %61, %65 : vector<8x256xi1>, vector<8x256xf32>
    %67 = tpu.concatenate %28, %33, %39, %44, %9, %49, %55, %60, %66 in 0 : vector<8x256xf32>, vector<8x256xf32>, vector<8x256xf32>, vector<8x256xf32>, vector<8x256xf32>, vector<8x256xf32>, vector<8x256xf32>, vector<8x256xf32>, vector<8x256xf32> -> vector<72x256xf32>
    %68 = arith.truncf %67 : vector<72x256xf32> to vector<72x256xbf16>
    %c0_20 = arith.constant 0 : index
    %c0_21 = arith.constant 0 : index
    %69 = vector.load %arg3[%c0_20, %c0_21] : memref<8x72xbf16, #tpu.memory_space<vmem>>, vector<8x72xbf16>
    %cst_22 = arith.constant dense<0.000000e+00> : vector<8x256xf32>
    %70 = tpu.matmul %69, %68, %cst_22 {dimension_numbers = #tpu.dot_dimension_numbers<[1], [0], [0], [1], [0, 0, 1, 1], [], []>} : vector<8x72xbf16>, vector<72x256xbf16>, vector<8x256xf32> -> vector<8x256xf32>
    %c0_23 = arith.constant 0 : index
    %c0_24 = arith.constant 0 : index
    %71 = vector.load %arg6[%c0_23, %c0_24] : memref<8x1xf32, #tpu.memory_space<vmem>>, vector<8x1xf32>
    %72 = vector.broadcast %71 : vector<8x1xf32> to vector<8x256xf32>
    %73 = arith.addf %70, %72 : vector<8x256xf32>
    %cst_25 = arith.constant 0.000000e+00 : f32
    %74 = vector.broadcast %cst_25 : f32 to vector<8x256xf32>
    %75 = arith.maximumf %73, %74 : vector<8x256xf32>
    %76 = tpu.concatenate %75, %1 in 0 : vector<8x256xf32>, vector<4x256xf32> -> vector<12x256xf32>
    %77 = arith.truncf %76 : vector<12x256xf32> to vector<12x256xbf16>
    %c0_26 = arith.constant 0 : index
    %c0_27 = arith.constant 0 : index
    %78 = vector.load %arg4[%c0_26, %c0_27] : memref<16x12xbf16, #tpu.memory_space<vmem>>, vector<16x12xbf16>
    %cst_28 = arith.constant dense<0.000000e+00> : vector<16x256xf32>
    %79 = tpu.matmul %78, %77, %cst_28 {dimension_numbers = #tpu.dot_dimension_numbers<[1], [0], [0], [1], [0, 0, 1, 1], [], []>} : vector<16x12xbf16>, vector<12x256xbf16>, vector<16x256xf32> -> vector<16x256xf32>
    %c0_29 = arith.constant 0 : index
    %c0_30 = arith.constant 0 : index
    %80 = vector.load %arg7[%c0_29, %c0_30] : memref<16x1xf32, #tpu.memory_space<vmem>>, vector<16x1xf32>
    %81 = vector.broadcast %80 : vector<16x1xf32> to vector<16x256xf32>
    %82 = arith.addf %79, %81 : vector<16x256xf32>
    %cst_31 = arith.constant 0.000000e+00 : f32
    %83 = vector.broadcast %cst_31 : f32 to vector<16x256xf32>
    %84 = arith.maximumf %82, %83 : vector<16x256xf32>
    %c0_32 = arith.constant 0 : index
    %c0_33 = arith.constant 0 : index
    %c0_34 = arith.constant 0 : index
    %85 = vector.load %arg8[%c0_32, %c0_33, %c0_34] : memref<1x16x256xf32, #tpu.memory_space<vmem>>, vector<1x16x256xf32>
    %86 = vector.shape_cast %85 : vector<1x16x256xf32> to vector<16x256xf32>
    %87 = vector.shape_cast %84 : vector<16x256xf32> to vector<1x16x256xf32>
    tpu.vector_store %arg8[%c0_32, %c0_33, %c0_34], %87 {strides = array<i32>} : memref<1x16x256xf32, #tpu.memory_space<vmem>>, vector<1x16x256xf32>,
    return
  }
  func.func @transform_0(%arg0: i32) -> (i32, i32, i32) {
    %c0_i32 = arith.constant 0 : i32
    %c0_i32_0 = arith.constant 0 : i32
    %c0_i32_1 = arith.constant 0 : i32
    return %arg0, %c0_i32, %c0_i32_0 : i32, i32, i32
  }
  func.func @transform_1(%arg0: i32) -> (i32, i32) {
    %c0_i32 = arith.constant 0 : i32
    %c0_i32_0 = arith.constant 0 : i32
    %c0_i32_1 = arith.constant 0 : i32
    return %c0_i32, %c0_i32_0 : i32, i32
  }
  func.func @transform_2(%arg0: i32) -> (i32, i32) {
    %c0_i32 = arith.constant 0 : i32
    %c0_i32_0 = arith.constant 0 : i32
    %c0_i32_1 = arith.constant 0 : i32
    return %c0_i32, %c0_i32_0 : i32, i32
  }
  func.func @transform_3(%arg0: i32) -> (i32, i32) {
    %c0_i32 = arith.constant 0 : i32
    %c0_i32_0 = arith.constant 0 : i32
    %c0_i32_1 = arith.constant 0 : i32
    return %c0_i32, %c0_i32_0 : i32, i32
  }
  func.func @transform_4(%arg0: i32) -> (i32, i32) {
    %c0_i32 = arith.constant 0 : i32
    %c0_i32_0 = arith.constant 0 : i32
    %c0_i32_1 = arith.constant 0 : i32
    return %c0_i32, %c0_i32_0 : i32, i32
  }
  func.func @transform_5(%arg0: i32) -> (i32, i32) {
    %c0_i32 = arith.constant 0 : i32
    %c0_i32_0 = arith.constant 0 : i32
    %c0_i32_1 = arith.constant 0 : i32
    return %c0_i32, %c0_i32_0 : i32, i32
  }
  func.func @transform_6(%arg0: i32) -> (i32, i32) {
    %c0_i32 = arith.constant 0 : i32
    %c0_i32_0 = arith.constant 0 : i32
    %c0_i32_1 = arith.constant 0 : i32
    return %c0_i32, %c0_i32_0 : i32, i32
  }
  func.func @transform_7(%arg0: i32) -> (i32, i32, i32) {
    %c0_i32 = arith.constant 0 : i32
    %c0_i32_0 = arith.constant 0 : i32
    %c0_i32_1 = arith.constant 0 : i32
    return %arg0, %c0_i32, %c0_i32_0 : i32, i32, i32
  }
}

</mosaic_0001>

<bundles_post_ra>
// kernel: bottleneck_forward.1
= control target key start
LH: loop header
LB: loop body
LE: loop exit
PB: predicated region body
PF: predicated region fallthrough
CT: control target
= control target key end

     0   :  { %s847_s24 = smov 0   ;;  %s1071_s0 = inlined_call_operand.vmem [shape: f32[2,4,256], index: 0, kind: input, shape index: {}]   ;;  %s1072_s1 = inlined_call_operand.vmem [shape: bf16[8,4], index: 1, kind: input, shape index: {}]   ;;  %s1073_s2 = inlined_call_operand.vmem [shape: bf16[8,72], index: 2, kind: input, shape index: {}]   ;;  %s1074_s3 = inlined_call_operand.vmem [shape: bf16[16,12], index: 3, kind: input, shape index: {}]   ;;  %s1075_s4 = inlined_call_operand.vmem [shape: f32[8,1], index: 4, kind: input, shape index: {}]   ;;  %s1076_s5 = inlined_call_operand.vmem [shape: f32[8,1], index: 5, kind: input, shape index: {}]   ;;  %s1077_s6 = inlined_call_operand.vmem [shape: f32[16,1], index: 6, kind: input, shape index: {}]   ;;  %s1078_s7 = inlined_call_operand.vmem [shape: f32[2,16,256], index: 7, kind: output, shape index: {}]  }
   0x1 LB: > { %s683_s25 = sadd.s32 4294967295, %s795_s24   ;;  %p687_p0 = scmp.ge.s32.totalorder %s795_s24, 1  ;;  %s795_s24 = sphi %s847_s24, %s17_s24  }
   0x2   : > { %p237_p1 = scmp.lt.s32.totalorder %s795_s24, 3 }
   0x4   : > { %p238_p2 = pnand %p687_p0, %p237_p1 }
   0x5   : > { %p269_p3 = scmp.lt.s32.totalorder (!%p238_p2), %s683_s25, 1  ;;  %v797_v0 = vmov (!%p238_p2), 0   ;;  %v287_v1 = vld [vmem:[%s1075_s4] sm:$0xff] (!%p238_p2)  ;;  %vm297_vm0 = vcmask (!%p238_p2), 1041408   ;;  %vm293_vm1 = vcmask (!%p238_p2), 31744   ;;  %s798_s11 = smov (!%p238_p2), 16   ;;  %v347_v21 = vlaneseq (!%p238_p2) }
   0x6   : > { %241 = sbr.rel (%p238_p2) target bundleno = 827 (0x33b), region = 48  ;;  %336 = vmatprep.mubr.bf16.mxu0 (!%p238_p2), %v797_v0  ;;  %745 = vset.pattern.permute.xlu0 (!%p238_p2), %v797_v0  ;;  %v286_v7 = vld [vmem:[%s1072_s1] sm:$0xf] (!%p238_p2)  ;;  %s799_s12 = smov (!%p238_p2), 17   ;;  %v550_v20 = vld [vmem:[%s1077_s6 + $0x8] sm:$0xff] (!%p238_p2) }
   0x7   : > { %290 = vperm.xlu0 (!%p238_p2), %745, %v287_v1   ;;  %534 = vmatprep.mubr.bf16.mxu1 (!%p238_p2), %v797_v0  ;;  %s800_s13 = smov (!%p238_p2), 15   ;;  %s801_s14 = smov (!%p238_p2), 1   ;;  %v549_v18 = vld [vmem:[%s1077_s6] sm:$0xff] (!%p238_p2)  ;;  %v896_v22 = vand.u32 (!%p238_p2), 127, %v347_v21 }
   0x8   : > { %786 = vset.pattern.permute.xlu1 (!%p238_p2), %v797_v0  ;;  %s802_s15 = smov (!%p238_p2), 127   ;;  %s803_s16 = smov (!%p238_p2), 113   ;;  %v485_v19 = vld [vmem:[%s1076_s5] sm:$0xff] (!%p238_p2) }
   0x9   : > { %s804_s17 = smov (!%p238_p2), 112   ;;  %s805_s18 = smov (!%p238_p2), 111   ;;  %v349_v23 = vadd.s32 (!%p238_p2), 128, %v896_v22  ;;  %v350_v26 = vand.u32 (!%p238_p2), 15, %v896_v22  ;;  %v352_v27 = vshra.s32 (!%p238_p2), %v896_v22, 4  ;;  %vm366_vm8 = vcmp.lt.s32.totalorder (!%p238_p2), %v896_v22, 17 }
   0xa   : > { %vm381_vm9 = vcmp.lt.s32.totalorder (!%p238_p2), %v896_v22, 16  ;;  %vm394_vm13 = vcmp.lt.s32.totalorder (!%p238_p2), %v896_v22, 15  ;;  %v484_v31 = vld [vmem:[%s1073_s2] sm:$0xf] (!%p238_p2) }
   0xb   : > { %v351_v24 = vand.u32 (!%p238_p2), 15, %v349_v23  ;;  %v353_v25 = vshra.s32 (!%p238_p2), %v349_v23, 4  ;;  %vm909_vm4 = vcmp.ge.s32.totalorder (!%p238_p2), %v352_v27, 1  ;;  %vm913_vm5 = vcmp.ge.s32.totalorder (!%p238_p2), %v350_v26, 1 }
   0xc   : > { %vm369_vm7 = vmand (!%p238_p2), %vm909_vm4, %vm913_vm5  ;;  %vm931_vm11 = vcmp.lt.s32.totalorder (!%p238_p2), %v350_v26, 15 }
   0xd   : > { %s1108_s25 = smov (!%p269_p3, %s683_s25), 1  ;;  %vm901_vm2 = vcmp.ge.s32.totalorder %v353_v25, 1  ;;  %vm905_vm3 = vcmp.ge.s32.totalorder %v351_v24, 1  ;;  %vm927_vm10 = vcmp.lt.s32.totalorder %v351_v24, 15  ;;  %vm944_vm14 = vmpackc.low %vm909_vm4, %vm369_vm7  ;;  %vm422_vm7 = vcmp.lt.s32.totalorder %v896_v22, 127 }
   0xe   : > { %s725_s28 = sshll.u32 %s1108_s25, 3  ;;  %vm370_vm6 = vmand %vm901_vm2, %vm905_vm3 }
   0xf   : > { %s273_s8 = scalar_lea.vmem %s1071_s0, %s725_s28  ;;  %vm937_vm12 = vmpackc.low %vm901_vm2, %vm370_vm6  ;;  %vm965_vm6 = vcmp.lt.s32.totalorder %v353_v25, 15 }
  0x10   : > { %v864_v2 = vld [vmem:[%s273_s8] sm:$0xff]  ;;  %vm398_vm15 = vmand %vm901_vm2, %vm927_vm10  ;;  %s726_s8 = sshll.u32 %s1108_s25, 5 }
  0x11   : > { %v868_v3 = vcombine.high %v864_v2, %v864_v2  ;;  %v284_v4 = vpack.c.bf16 %v864_v2, %v864_v2  ;;  %vm961_vm2 = vmpackc.low %vm905_vm3, %vm398_vm15  ;;  %vm435_vm15 = vcmp.lt.s32.totalorder %v896_v22, 113 }
  0x13   : > { %v285_v5 = vpack.c.bf16 %v868_v3, %v868_v3  ;;  %v299_v6 = vsel %vm297_vm0, %v284_v4, 0 }
  0x15   : > { %692 = vmatprep.subr.msk.bf16.mxu0 %vm297_vm0, %v285_v5  ;;  %vm409_vm0 = vcmp.lt.s32.totalorder %v896_v22, 1 }
  0x16   : > { %305 = vmatpush1.bf16.msra.mxu0 %v299_v6 }
  0x19   : > { %693 = vmatmul.mubr.msk.bf16.vlgmr.msra.gmra.mrb[0].mxu0 %vm293_vm1, %v286_v7  ;;  %vm397_vm1 = vmand %vm909_vm4, %vm931_vm11 }
  0x1a   : > { %609 = vmatprep.mubr.bf16.mxu0 %v797_v0  ;;  %vm977_vm4 = vmpackc.low %vm913_vm5, %vm397_vm1  ;;  %vm450_vm1 = vcmp.lt.s32.totalorder %v896_v22, 112 }
  0x86   : > { %v291_v8 = vpop.permute.xlu0 %290 }
  0xec   : > { %v338_v9 = vpop.f32.mrb[0].mxu0 }
  0xed   : > { %v877_v10 = vadd.f32 %v338_v9, %v291_v8  ;;  %v340_v11 = vpop.f32.mrb[1].mxu0 }
  0xee   : > { %v879_v12 = vadd.f32 %v340_v11, %v291_v8  ;;  %v342_v13 = vpop.f32.mrb[2].mxu0 }
  0xef   : > { %v345_v14 = vmax.f32 %v877_v10, 0.0  ;;  %v343_v15 = vpop.f32.mrb[3].mxu0 }
  0xf0   : > { %v346_v16 = vmax.f32 %v879_v12, 0.0 }
  0xf2   : > { %v751_v17 = vpack.i.bf16 %v346_v16, %v345_v14 }
  0xf4   : > { %752 = vrot.lane.b32.xlu1 %v751_v17, %s798_s11  ;;  %747 = vrot.lane.b32.xlu0 %v751_v17, %s799_s12  ;;  %s278_s11 = scalar_lea.vmem %s1078_s7, %s726_s8 }
  0xf8   : > { %757 = vrot.lane.b32.xlu1 %v751_v17, %s800_s13  ;;  %762 = vrot.lane.b32.xlu0 %v751_v17, %s801_s14 }
  0xfc   : > { %767 = vrot.lane.b32.xlu1 %v751_v17, %s802_s15  ;;  %772 = vrot.lane.b32.xlu0 %v751_v17, %s803_s16 }
 0x100   : > { %777 = vrot.lane.b32.xlu1 %v751_v17, %s804_s17  ;;  %782 = vrot.lane.b32.xlu0 %v751_v17, %s805_s18 }
 0x104   : > { %553 = vperm.xlu0 %745, %v549_v18   ;;  %488 = vperm.xlu1 %786, %v485_v19  }
 0x108   : > { %558 = vperm.xlu1 %786, %v550_v20  }
 0x166   : > { %v753_v32 = vpop.permute.xlu1 %752  ;;  %v748_v33 = vpop.permute.xlu0 %747 }
 0x167   : > { %v755_v36 = vunpack.i.h.bf16 %v753_v32  ;;  %v754_v37 = vunpack.i.l.bf16 %v753_v32  ;;  %v750_v38 = vunpack.i.h.bf16 %v748_v33  ;;  %v749_v39 = vunpack.i.l.bf16 %v748_v33 }
 0x169   : > { %v367_v42 = vsel %vm366_vm8, %v749_v39, %v750_v38  ;;  %v382_v43 = vsel %vm381_vm9, %v754_v37, %v755_v36  ;;  %v368_v44 = vsel %vm366_vm8, %v750_v38, %v749_v39  ;;  %v383_v45 = vsel %vm381_vm9, %v755_v36, %v754_v37 }
 0x16a   : > { %v758_v46 = vpop.permute.xlu1 %757  ;;  %v763_v47 = vpop.permute.xlu0 %762  ;;  %v695_v48 = vpack.c.bf16 %v382_v43, %v367_v42  ;;  %v698_v49 = vpack.c.bf16 %v383_v45, %v368_v44  ;;  %vm806_vm8 = vmmov 1  }
 0x16b   : > { %v760_v50 = vunpack.i.h.bf16 %v758_v46  ;;  %v759_v51 = vunpack.i.l.bf16 %v758_v46  ;;  %v765_v52 = vunpack.i.h.bf16 %v763_v47  ;;  %v764_v53 = vunpack.i.l.bf16 %v763_v47  ;;  %vm984_vm9 = vmpackc.low %vm927_vm10, %vm806_vm8  ;;  %v788_v46 = vld [vmem:[%s1074_s3] sm:$0xff]  }
 0x16c   : > { %696 = vmatprep.subr.msk.bf16.mxu1 %vm937_vm12, %v695_v48  ;;  %vm990_vm12 = vmpackc.low %vm931_vm11, %vm806_vm8 }
 0x16d   : > { %v395_v56 = vsel %vm394_vm13, %v759_v51, %v760_v50  ;;  %v396_v57 = vsel %vm394_vm13, %v760_v50, %v759_v51  ;;  %v410_v58 = vsel %vm409_vm0, %v764_v53, %v765_v52  ;;  %v411_v59 = vsel %vm409_vm0, %v765_v52, %v764_v53  ;;  %699 = vmatpush1.bf16.msk.msra.mxu1 %vm944_vm14, %v698_v49  ;;  %vm439_vm13 = vmand %vm965_vm6, %vm905_vm3 }
 0x16e   : > { %v701_v61 = vpack.c.bf16 %v410_v58, %v395_v56  ;;  %v704_v62 = vpack.c.bf16 %v411_v59, %v396_v57  ;;  %v768_v63 = vpop.permute.xlu1 %767  ;;  %v773_v0 = vpop.permute.xlu0 %772  ;;  %vm1000_vm14 = vcmp.lt.s32.totalorder %v352_v27, 15  ;;  %vm467_vm0 = vmand %vm965_vm6, %vm927_vm10  ;;  %vm495_vm3 = vcmask 1043456  }
 0x16f   : > { %v770_v4 = vunpack.i.h.bf16 %v768_v63  ;;  %v769_v5 = vunpack.i.l.bf16 %v768_v63  ;;  %v775_v7 = vunpack.i.h.bf16 %v773_v0  ;;  %v774_v8 = vunpack.i.l.bf16 %v773_v0 }
 0x170   : > { %702 = vmatprep.subr.msk.bf16.mxu1 %vm961_vm2, %v701_v61  ;;  %vm463_vm2 = vcmp.lt.s32.totalorder %v896_v22, 111  ;;  %vm570_vm10 = vcmask 1045504  }
 0x171   : > { %v423_v11 = vsel %vm422_vm7, %v769_v5, %v770_v4  ;;  %v424_v13 = vsel %vm422_vm7, %v770_v4, %v769_v5  ;;  %705 = vmatpush1.bf16.msk.msra.mxu1 %vm977_vm4, %v704_v62  ;;  %vm438_vm4 = vmand %vm1000_vm14, %vm913_vm5  ;;  %v436_v10 = vsel %vm435_vm15, %v774_v8, %v775_v7  ;;  %v437_v12 = vsel %vm435_vm15, %v775_v7, %v774_v8 }
 0x172   : > { %v707_v15 = vpack.c.bf16 %v424_v13, %v346_v16  ;;  %v710_v17 = vpack.c.bf16 %v423_v11, %v345_v14  ;;  %v778_v18 = vpop.permute.xlu1 %777  ;;  %v783_v19 = vpop.permute.xlu0 %782  ;;  %vm466_vm7 = vmand %vm1000_vm14, %vm931_vm11  ;;  %vm491_vm5 = vcmask 588800  }
 0x173   : > { %v780_v20 = vunpack.i.h.bf16 %v778_v18  ;;  %v779_v21 = vunpack.i.l.bf16 %v778_v18  ;;  %v785_v23 = vunpack.i.h.bf16 %v783_v19  ;;  %v784_v24 = vunpack.i.l.bf16 %v783_v19  ;;  %vm712_vm11 = vmpackc.low %vm965_vm6, %vm439_vm13 }
 0x174   : > { %708 = vmatprep.subr.msk.bf16.mxu1 %vm984_vm9, %v707_v15  ;;  %vm715_vm8 = vmpackc.low %vm1000_vm14, %vm438_vm4  ;;  %vm566_vm6 = vcmask 97280  }
 0x175   : > { %v451_v14 = vsel %vm450_vm1, %v779_v21, %v780_v20  ;;  %v452_v16 = vsel %vm450_vm1, %v780_v20, %v779_v21  ;;  %v465_v25 = vsel %vm463_vm2, %v785_v23, %v784_v24  ;;  %711 = vmatpush1.bf16.msk.msra.mxu1 %vm990_vm12, %v710_v17  ;;  %v464_v26 = vsel %vm463_vm2, %v784_v24, %v785_v23 }
 0x176   : > { %v713_v27 = vpack.c.bf16 %v452_v16, %v437_v12  ;;  %v716_v28 = vpack.c.bf16 %v451_v14, %v436_v10  ;;  %v473_v29 = vsel %vm467_vm0, %v465_v25, 0.0  ;;  %v472_v30 = vsel %vm466_vm7, %v464_v26, 0.0 }
 0x177   : > { %v483_v32 = vpack.c.bf16 %v473_v29, %v473_v29  ;;  %v482_v22 = vpack.c.bf16 %v472_v30, %v472_v30 }
 0x178   : > { %714 = vmatprep.subr.msk.bf16.mxu1 %vm712_vm11, %v713_v27 }
 0x179   : > { %717 = vmatpush1.bf16.msk.msra.mxu1 %vm715_vm8, %v716_v28  ;;  %v497_v33 = vsel %vm495_vm3, %v482_v22, 0 }
 0x17a   : > { %718 = vmatprep.subr.msk.bf16.mxu1 %vm495_vm3, %v483_v32 }
 0x17d   : > { %511 = vmatpush1.bf16.msra.mxu1 %v497_v33 }
 0x180   : > { %719 = vmatmul.mubr.msk.bf16.vlgmr.msra.gmra.mrb[0].mxu1 %vm491_vm5, %v484_v31 }
 0x183   : > { %v489_v35 = vpop.permute.xlu1 %488  ;;  %v554_v47 = vpop.permute.xlu0 %553 }
 0x187   : > { %v559_v51 = vpop.permute.xlu1 %558 }
 0x253   : > { %v536_v36 = vpop.f32.mrb[0].mxu1 }
 0x254   : > { %v537_v34 = vadd.f32 %v536_v36, %v489_v35  ;;  %v538_v37 = vpop.f32.mrb[1].mxu1 }
 0x255   : > { %v539_v38 = vadd.f32 %v538_v37, %v489_v35  ;;  %v540_v39 = vpop.f32.mrb[2].mxu1 }
 0x256   : > { %v543_v40 = vmax.f32 %v537_v34, 0.0  ;;  %v541_v41 = vpop.f32.mrb[3].mxu1 }
 0x257   : > { %v544_v42 = vmax.f32 %v539_v38, 0.0 }
 0x258   : > { %v545_v43 = vpack.c.bf16 %v864_v2, %v543_v40 }
 0x259   : > { %v546_v44 = vpack.c.bf16 %v868_v3, %v544_v42 }
 0x25a   : > { %v572_v45 = vsel %vm570_vm10, %v545_v43, 0 }
 0x25b   : > { %721 = vmatprep.subr.msk.bf16.mxu0 %vm570_vm10, %v546_v44 }
 0x25c   : > { %578 = vmatpush1.bf16.msra.mxu0 %v572_v45 }
 0x25f   : > { %722 = vmatmul.mubr.msk.bf16.vlgmr.msra.gmra.mrb[4].mxu0 %vm566_vm6, %v788_v46 }
 0x332   : > { %v611_v48 = vpop.f32.mrb[4].mxu0 }
 0x333   : > { %v612_v49 = vadd.f32 %v611_v48, %v554_v47  ;;  %v613_v50 = vpop.f32.mrb[5].mxu0 }
 0x334   : > { %v614_v2 = vadd.f32 %v613_v50, %v554_v47  ;;  %v615_v3 = vpop.f32.mrb[6].mxu0 }
 0x335   : > { %v620_v52 = vmax.f32 %v612_v49, 0.0  ;;  %v616_v53 = vadd.f32 %v615_v3, %v559_v51  ;;  %v617_v54 = vpop.f32.mrb[7].mxu0 }
 0x336   : > { %v621_v55 = vmax.f32 %v614_v2, 0.0  ;;  %v618_v56 = vadd.f32 %v617_v54, %v559_v51 }
 0x337   : > { %624 = vst [vmem:[%s278_s11] sm:$0xff] %v620_v52  ;;  %v622_v57 = vmax.f32 %v616_v53, 0.0 }
 0x338   : > { %625 = vst [vmem:[%s278_s11 + $0x8] sm:$0xff] %v621_v55  ;;  %v623_v58 = vmax.f32 %v618_v56, 0.0 }
 0x339   : > { %626 = vst [vmem:[%s278_s11 + $0x10] sm:$0xff] %v622_v57 }
 0x33a   : > { %627 = vst [vmem:[%s278_s11 + $0x18] sm:$0xff] %v623_v58 }
 0x33b PF: > { %s17_s24 = sadd.s32 1, %s795_s24  }
 0x33c   : > { %p14_p4 = scmp.ge.s32.totalorder %s17_s24, 4  }
 0x33e   :  { %16 = sbr.rel (!%p14_p4) target bundleno = 1 (0x1), region = 78 }

</bundles_post_ra>
